<compile_context>
chip_gen: v5e
topology: v5e:2x2
jax: 0.10.0
libtpu: 0.0.40
codegen_flags: <defaults>
</compile_context>

<pallas_src>
import functools

import jax
import jax.numpy as jnp
from jax.experimental import pallas as pl
from jax.experimental.pallas import tpu as pltpu  # noqa: F401  (TPU backend import)

BETA = 0.95
THRESHOLD = 1.0


def snn_kernel(x_ref, w1_ref, b1_ref, w2_ref, b2_ref, out_ref):
    """Whole SNN forward in a single invocation (everything VMEM-resident).

    x_ref:  [B, F]        w1_ref: [F, H]   b1_ref: [1, H]
    w2_ref: [H, O_pad]    b2_ref: [1, O_pad]
    out_ref: [2, num_steps, B, O_pad]   ([0] = spikes, [1] = membrane)
    """
    num_steps = out_ref.shape[1]
    B = x_ref.shape[0]
    H = w1_ref.shape[1]
    O = w2_ref.shape[1]

    # Layer-1 current is time-invariant: exactly one MXU call for layer 1.
    cur1 = jnp.dot(x_ref[...], w1_ref[...],
                   preferred_element_type=jnp.float32) + b1_ref[...]

    # Layer-1 Leaky recurrence for all steps (pure VPU work); collect spikes.
    mem1 = jnp.zeros((B, H), jnp.float32)
    spk1_steps = []
    for _ in range(num_steps):
        reset1 = (mem1 > THRESHOLD).astype(jnp.float32)
        mem1 = BETA * mem1 + cur1 - reset1 * THRESHOLD
        spk1_steps.append((mem1 > THRESHOLD).astype(jnp.float32))

    # ONE batched layer-2 matmul: (num_steps*B, H) @ (H, O_pad).
    spk1_all = jnp.concatenate(spk1_steps, axis=0)
    cur2_all = jnp.dot(spk1_all, w2_ref[...],
                       preferred_element_type=jnp.float32) + b2_ref[...]

    # Layer-2 Leaky recurrence (elementwise over sublane-aligned row blocks).
    mem2 = jnp.zeros((B, O), jnp.float32)
    spk2_steps, mem2_steps = [], []
    for t in range(num_steps):
        cur2 = cur2_all[t * B:(t + 1) * B, :]     # static, (8,128)-tile-aligned slice
        reset2 = (mem2 > THRESHOLD).astype(jnp.float32)
        mem2 = BETA * mem2 + cur2 - reset2 * THRESHOLD
        spk2_steps.append((mem2 > THRESHOLD).astype(jnp.float32))
        mem2_steps.append(mem2)

    # Single merged, lane-dense store for both outputs.
    out_ref[...] = jnp.stack(
        [jnp.stack(spk2_steps, axis=0), jnp.stack(mem2_steps, axis=0)], axis=0)


@functools.partial(jax.jit, static_argnames=("num_steps",))
def snn_forward(x, w1, b1, w2, b2, num_steps):
    """x: [B, F]; w1: [F, H]; b1: [1, H]; w2: [H, O]; b2: [1, O].

    Returns (spikes, membrane), each [num_steps, B, O] (time-major, matching
    torch.stack(..., dim=0)).
    """
    B, F = x.shape
    H = w1.shape[1]
    O = w2.shape[1]

    # Pad the output feature dim to a multiple of 128 so all stores are lane-dense
    # (unmasked 128-wide vst).  Padded columns have zero weight/bias -> membrane stays 0
    # and (THRESHOLD > 0) they never spike; they are sliced off below.
    O_pad = ((O + 127) // 128) * 128
    if O_pad != O:
        w2p = jnp.pad(w2, ((0, 0), (0, O_pad - O)))
        b2p = jnp.pad(b2, ((0, 0), (0, O_pad - O)))
    else:
        w2p, b2p = w2, b2

    out = pl.pallas_call(
        snn_kernel,
        out_shape=jax.ShapeDtypeStruct((2, num_steps, B, O_pad), jnp.float32),
        in_specs=[
            pl.BlockSpec((B, F), lambda: (0, 0)),
            pl.BlockSpec((F, H), lambda: (0, 0)),
            pl.BlockSpec((1, H), lambda: (0, 0)),
            pl.BlockSpec((H, O_pad), lambda: (0, 0)),
            pl.BlockSpec((1, O_pad), lambda: (0, 0)),
        ],
        out_specs=pl.BlockSpec((2, num_steps, B, O_pad), lambda: (0, 0, 0, 0)),
    )(x, w1, b1, w2p, b2p)

    return out[0, :, :, :O], out[1, :, :, :O]


def reference_forward(x, w1, b1, w2, b2, num_steps):
    """Pure-JAX reference mirroring the PyTorch/snntorch forward."""
    B = x.shape[0]
    H = w1.shape[1]
    O = w2.shape[1]
    mem1 = jnp.zeros((B, H), jnp.float32)
    mem2 = jnp.zeros((B, O), jnp.float32)
    spks, mems = [], []
    for _ in range(num_steps):
        cur1 = x @ w1 + b1
        reset1 = (mem1 > THRESHOLD).astype(jnp.float32)
        mem1 = BETA * mem1 + cur1 - reset1 * THRESHOLD
        spk1 = (mem1 > THRESHOLD).astype(jnp.float32)
        cur2 = spk1 @ w2 + b2
        reset2 = (mem2 > THRESHOLD).astype(jnp.float32)
        mem2 = BETA * mem2 + cur2 - reset2 * THRESHOLD
        spk2 = (mem2 > THRESHOLD).astype(jnp.float32)
        spks.append(spk2)
        mems.append(mem2)
    return jnp.stack(spks, 0), jnp.stack(mems, 0)


if __name__ == "__main__":
    # Small shapes consistent with the module: flattened 8x8 "image" inputs.
    B = 8            # batch
    NUM_INPUTS = 64  # flattened image
    NUM_HIDDEN = 128
    NUM_OUTPUTS = 16
    NUM_STEPS = 8

    key = jax.random.PRNGKey(0)
    kx, k1, kb1, k2, kb2 = jax.random.split(key, 5)

    x = jax.random.normal(kx, (B, NUM_INPUTS), jnp.float32)

    # PyTorch Linear-style uniform(-1/sqrt(fan_in), 1/sqrt(fan_in)) init,
    # stored pre-transposed as [in, out] for x @ W in the kernel.
    lim1 = 1.0 / jnp.sqrt(NUM_INPUTS)
    w1 = jax.random.uniform(k1, (NUM_INPUTS, NUM_HIDDEN), jnp.float32, -lim1, lim1)
    b1 = jax.random.uniform(kb1, (1, NUM_HIDDEN), jnp.float32, -lim1, lim1)
    lim2 = 1.0 / jnp.sqrt(NUM_HIDDEN)
    w2 = jax.random.uniform(k2, (NUM_HIDDEN, NUM_OUTPUTS), jnp.float32, -lim2, lim2)
    b2 = jax.random.uniform(kb2, (1, NUM_OUTPUTS), jnp.float32, -lim2, lim2)

    spk_out, mem_out = snn_forward(x, w1, b1, w2, b2, NUM_STEPS)
    jax.block_until_ready((spk_out, mem_out))

    spk_ref, mem_ref = reference_forward(x, w1, b1, w2, b2, NUM_STEPS)
    assert spk_out.shape == (NUM_STEPS, B, NUM_OUTPUTS)
    assert mem_out.shape == (NUM_STEPS, B, NUM_OUTPUTS)
    assert jnp.allclose(spk_out, spk_ref, atol=1e-5)
    assert jnp.allclose(mem_out, mem_ref, atol=1e-5)

    print("KERNEL_OK")
</pallas_src>

<mosaic_0001>
module attributes {stable_mosaic.version = 11 : i64} {
  func.func @snn_kernel(%arg0: memref<8x64xf32, #tpu.memory_space<vmem>>, %arg1: memref<64x128xf32, #tpu.memory_space<vmem>>, %arg2: memref<1x128xf32, #tpu.memory_space<vmem>>, %arg3: memref<128x128xf32, #tpu.memory_space<vmem>>, %arg4: memref<1x128xf32, #tpu.memory_space<vmem>>, %arg5: memref<2x8x8x128xf32, #tpu.memory_space<vmem>>) attributes {dimension_semantics = [], scalar_prefetch = 0 : i64, scratch_operands = 0 : i64, tpu.core_type = #tpu.core_type<tc>} {
    %c0 = arith.constant 0 : index
    %c0_0 = arith.constant 0 : index
    %0 = vector.load %arg0[%c0, %c0_0] : memref<8x64xf32, #tpu.memory_space<vmem>>, vector<8x64xf32>
    %c0_1 = arith.constant 0 : index
    %c0_2 = arith.constant 0 : index
    %1 = vector.load %arg1[%c0_1, %c0_2] : memref<64x128xf32, #tpu.memory_space<vmem>>, vector<64x128xf32>
    %cst = arith.constant dense<0.000000e+00> : vector<8x128xf32>
    %2 = tpu.matmul %0, %1, %cst {dimension_numbers = #tpu.dot_dimension_numbers<[1], [0], [0], [1], [0, 0, 1, 1], [], []>} : vector<8x64xf32>, vector<64x128xf32>, vector<8x128xf32> -> vector<8x128xf32>
    %c0_3 = arith.constant 0 : index
    %c0_4 = arith.constant 0 : index
    %3 = vector.load %arg2[%c0_3, %c0_4] : memref<1x128xf32, #tpu.memory_space<vmem>>, vector<1x128xf32>
    %4 = vector.broadcast %3 : vector<1x128xf32> to vector<8x128xf32>
    %5 = arith.addf %2, %4 : vector<8x128xf32>
    %cst_5 = arith.constant 0.000000e+00 : f32
    %6 = vector.broadcast %cst_5 : f32 to vector<8x128xf32>
    %cst_6 = arith.constant 1.000000e+00 : f32
    %7 = vector.broadcast %cst_6 : f32 to vector<8x128xf32>
    %8 = arith.cmpf ogt, %6, %7 : vector<8x128xf32>
    %9 = arith.extui %8 : vector<8x128xi1> to vector<8x128xi32>
    %10 = arith.sitofp %9 : vector<8x128xi32> to vector<8x128xf32>
    %cst_7 = arith.constant 0.949999988 : f32
    %11 = vector.broadcast %cst_7 : f32 to vector<8x128xf32>
    %12 = arith.mulf %11, %6 : vector<8x128xf32>
    %13 = arith.addf %12, %5 : vector<8x128xf32>
    %cst_8 = arith.constant 1.000000e+00 : f32
    %14 = vector.broadcast %cst_8 : f32 to vector<8x128xf32>
    %15 = arith.mulf %10, %14 : vector<8x128xf32>
    %16 = arith.subf %13, %15 : vector<8x128xf32>
    %cst_9 = arith.constant 1.000000e+00 : f32
    %17 = vector.broadcast %cst_9 : f32 to vector<8x128xf32>
    %18 = arith.cmpf ogt, %16, %17 : vector<8x128xf32>
    %19 = arith.extui %18 : vector<8x128xi1> to vector<8x128xi32>
    %20 = arith.sitofp %19 : vector<8x128xi32> to vector<8x128xf32>
    %cst_10 = arith.constant 1.000000e+00 : f32
    %21 = vector.broadcast %cst_10 : f32 to vector<8x128xf32>
    %22 = arith.cmpf ogt, %16, %21 : vector<8x128xf32>
    %23 = arith.extui %22 : vector<8x128xi1> to vector<8x128xi32>
    %24 = arith.sitofp %23 : vector<8x128xi32> to vector<8x128xf32>
    %cst_11 = arith.constant 0.949999988 : f32
    %25 = vector.broadcast %cst_11 : f32 to vector<8x128xf32>
    %26 = arith.mulf %25, %16 : vector<8x128xf32>
    %27 = arith.addf %26, %5 : vector<8x128xf32>
    %cst_12 = arith.constant 1.000000e+00 : f32
    %28 = vector.broadcast %cst_12 : f32 to vector<8x128xf32>
    %29 = arith.mulf %24, %28 : vector<8x128xf32>
    %30 = arith.subf %27, %29 : vector<8x128xf32>
    %cst_13 = arith.constant 1.000000e+00 : f32
    %31 = vector.broadcast %cst_13 : f32 to vector<8x128xf32>
    %32 = arith.cmpf ogt, %30, %31 : vector<8x128xf32>
    %33 = arith.extui %32 : vector<8x128xi1> to vector<8x128xi32>
    %34 = arith.sitofp %33 : vector<8x128xi32> to vector<8x128xf32>
    %cst_14 = arith.constant 1.000000e+00 : f32
    %35 = vector.broadcast %cst_14 : f32 to vector<8x128xf32>
    %36 = arith.cmpf ogt, %30, %35 : vector<8x128xf32>
    %37 = arith.extui %36 : vector<8x128xi1> to vector<8x128xi32>
    %38 = arith.sitofp %37 : vector<8x128xi32> to vector<8x128xf32>
    %cst_15 = arith.constant 0.949999988 : f32
    %39 = vector.broadcast %cst_15 : f32 to vector<8x128xf32>
    %40 = arith.mulf %39, %30 : vector<8x128xf32>
    %41 = arith.addf %40, %5 : vector<8x128xf32>
    %cst_16 = arith.constant 1.000000e+00 : f32
    %42 = vector.broadcast %cst_16 : f32 to vector<8x128xf32>
    %43 = arith.mulf %38, %42 : vector<8x128xf32>
    %44 = arith.subf %41, %43 : vector<8x128xf32>
    %cst_17 = arith.constant 1.000000e+00 : f32
    %45 = vector.broadcast %cst_17 : f32 to vector<8x128xf32>
    %46 = arith.cmpf ogt, %44, %45 : vector<8x128xf32>
    %47 = arith.extui %46 : vector<8x128xi1> to vector<8x128xi32>
    %48 = arith.sitofp %47 : vector<8x128xi32> to vector<8x128xf32>
    %cst_18 = arith.constant 1.000000e+00 : f32
    %49 = vector.broadcast %cst_18 : f32 to vector<8x128xf32>
    %50 = arith.cmpf ogt, %44, %49 : vector<8x128xf32>
    %51 = arith.extui %50 : vector<8x128xi1> to vector<8x128xi32>
    %52 = arith.sitofp %51 : vector<8x128xi32> to vector<8x128xf32>
    %cst_19 = arith.constant 0.949999988 : f32
    %53 = vector.broadcast %cst_19 : f32 to vector<8x128xf32>
    %54 = arith.mulf %53, %44 : vector<8x128xf32>
    %55 = arith.addf %54, %5 : vector<8x128xf32>
    %cst_20 = arith.constant 1.000000e+00 : f32
    %56 = vector.broadcast %cst_20 : f32 to vector<8x128xf32>
    %57 = arith.mulf %52, %56 : vector<8x128xf32>
    %58 = arith.subf %55, %57 : vector<8x128xf32>
    %cst_21 = arith.constant 1.000000e+00 : f32
    %59 = vector.broadcast %cst_21 : f32 to vector<8x128xf32>
    %60 = arith.cmpf ogt, %58, %59 : vector<8x128xf32>
    %61 = arith.extui %60 : vector<8x128xi1> to vector<8x128xi32>
    %62 = arith.sitofp %61 : vector<8x128xi32> to vector<8x128xf32>
    %cst_22 = arith.constant 1.000000e+00 : f32
    %63 = vector.broadcast %cst_22 : f32 to vector<8x128xf32>
    %64 = arith.cmpf ogt, %58, %63 : vector<8x128xf32>
    %65 = arith.extui %64 : vector<8x128xi1> to vector<8x128xi32>
    %66 = arith.sitofp %65 : vector<8x128xi32> to vector<8x128xf32>
    %cst_23 = arith.constant 0.949999988 : f32
    %67 = vector.broadcast %cst_23 : f32 to vector<8x128xf32>
    %68 = arith.mulf %67, %58 : vector<8x128xf32>
    %69 = arith.addf %68, %5 : vector<8x128xf32>
    %cst_24 = arith.constant 1.000000e+00 : f32
    %70 = vector.broadcast %cst_24 : f32 to vector<8x128xf32>
    %71 = arith.mulf %66, %70 : vector<8x128xf32>
    %72 = arith.subf %69, %71 : vector<8x128xf32>
    %cst_25 = arith.constant 1.000000e+00 : f32
    %73 = vector.broadcast %cst_25 : f32 to vector<8x128xf32>
    %74 = arith.cmpf ogt, %72, %73 : vector<8x128xf32>
    %75 = arith.extui %74 : vector<8x128xi1> to vector<8x128xi32>
    %76 = arith.sitofp %75 : vector<8x128xi32> to vector<8x128xf32>
    %cst_26 = arith.constant 1.000000e+00 : f32
    %77 = vector.broadcast %cst_26 : f32 to vector<8x128xf32>
    %78 = arith.cmpf ogt, %72, %77 : vector<8x128xf32>
    %79 = arith.extui %78 : vector<8x128xi1> to vector<8x128xi32>
    %80 = arith.sitofp %79 : vector<8x128xi32> to vector<8x128xf32>
    %cst_27 = arith.constant 0.949999988 : f32
    %81 = vector.broadcast %cst_27 : f32 to vector<8x128xf32>
    %82 = arith.mulf %81, %72 : vector<8x128xf32>
    %83 = arith.addf %82, %5 : vector<8x128xf32>
    %cst_28 = arith.constant 1.000000e+00 : f32
    %84 = vector.broadcast %cst_28 : f32 to vector<8x128xf32>
    %85 = arith.mulf %80, %84 : vector<8x128xf32>
    %86 = arith.subf %83, %85 : vector<8x128xf32>
    %cst_29 = arith.constant 1.000000e+00 : f32
    %87 = vector.broadcast %cst_29 : f32 to vector<8x128xf32>
    %88 = arith.cmpf ogt, %86, %87 : vector<8x128xf32>
    %89 = arith.extui %88 : vector<8x128xi1> to vector<8x128xi32>
    %90 = arith.sitofp %89 : vector<8x128xi32> to vector<8x128xf32>
    %cst_30 = arith.constant 1.000000e+00 : f32
    %91 = vector.broadcast %cst_30 : f32 to vector<8x128xf32>
    %92 = arith.cmpf ogt, %86, %91 : vector<8x128xf32>
    %93 = arith.extui %92 : vector<8x128xi1> to vector<8x128xi32>
    %94 = arith.sitofp %93 : vector<8x128xi32> to vector<8x128xf32>
    %cst_31 = arith.constant 0.949999988 : f32
    %95 = vector.broadcast %cst_31 : f32 to vector<8x128xf32>
    %96 = arith.mulf %95, %86 : vector<8x128xf32>
    %97 = arith.addf %96, %5 : vector<8x128xf32>
    %cst_32 = arith.constant 1.000000e+00 : f32
    %98 = vector.broadcast %cst_32 : f32 to vector<8x128xf32>
    %99 = arith.mulf %94, %98 : vector<8x128xf32>
    %100 = arith.subf %97, %99 : vector<8x128xf32>
    %cst_33 = arith.constant 1.000000e+00 : f32
    %101 = vector.broadcast %cst_33 : f32 to vector<8x128xf32>
    %102 = arith.cmpf ogt, %100, %101 : vector<8x128xf32>
    %103 = arith.extui %102 : vector<8x128xi1> to vector<8x128xi32>
    %104 = arith.sitofp %103 : vector<8x128xi32> to vector<8x128xf32>
    %cst_34 = arith.constant 1.000000e+00 : f32
    %105 = vector.broadcast %cst_34 : f32 to vector<8x128xf32>
    %106 = arith.cmpf ogt, %100, %105 : vector<8x128xf32>
    %107 = arith.extui %106 : vector<8x128xi1> to vector<8x128xi32>
    %108 = arith.sitofp %107 : vector<8x128xi32> to vector<8x128xf32>
    %cst_35 = arith.constant 0.949999988 : f32
    %109 = vector.broadcast %cst_35 : f32 to vector<8x128xf32>
    %110 = arith.mulf %109, %100 : vector<8x128xf32>
    %111 = arith.addf %110, %5 : vector<8x128xf32>
    %cst_36 = arith.constant 1.000000e+00 : f32
    %112 = vector.broadcast %cst_36 : f32 to vector<8x128xf32>
    %113 = arith.mulf %108, %112 : vector<8x128xf32>
    %114 = arith.subf %111, %113 : vector<8x128xf32>
    %cst_37 = arith.constant 1.000000e+00 : f32
    %115 = vector.broadcast %cst_37 : f32 to vector<8x128xf32>
    %116 = arith.cmpf ogt, %114, %115 : vector<8x128xf32>
    %117 = arith.extui %116 : vector<8x128xi1> to vector<8x128xi32>
    %118 = arith.sitofp %117 : vector<8x128xi32> to vector<8x128xf32>
    %119 = tpu.concatenate %20, %34, %48, %62, %76, %90, %104, %118 in 0 : vector<8x128xf32>, vector<8x128xf32>, vector<8x128xf32>, vector<8x128xf32>, vector<8x128xf32>, vector<8x128xf32>, vector<8x128xf32>, vector<8x128xf32> -> vector<64x128xf32>
    %c0_38 = arith.constant 0 : index
    %c0_39 = arith.constant 0 : index
    %120 = vector.load %arg3[%c0_38, %c0_39] : memref<128x128xf32, #tpu.memory_space<vmem>>, vector<128x128xf32>
    %cst_40 = arith.constant dense<0.000000e+00> : vector<64x128xf32>
    %121 = tpu.matmul %119, %120, %cst_40 {dimension_numbers = #tpu.dot_dimension_numbers<[1], [0], [0], [1], [0, 0, 1, 1], [], []>} : vector<64x128xf32>, vector<128x128xf32>, vector<64x128xf32> -> vector<64x128xf32>
    %c0_41 = arith.constant 0 : index
    %c0_42 = arith.constant 0 : index
    %122 = vector.load %arg4[%c0_41, %c0_42] : memref<1x128xf32, #tpu.memory_space<vmem>>, vector<1x128xf32>
    %123 = vector.broadcast %122 : vector<1x128xf32> to vector<64x128xf32>
    %124 = arith.addf %121, %123 : vector<64x128xf32>
    %cst_43 = arith.constant 0.000000e+00 : f32
    %125 = vector.broadcast %cst_43 : f32 to vector<8x128xf32>
    %126 = vector.extract_strided_slice %124 {offsets = [0, 0], sizes = [8, 128], strides = [1, 1]} : vector<64x128xf32> to vector<8x128xf32>
    %cst_44 = arith.constant 1.000000e+00 : f32
    %127 = vector.broadcast %cst_44 : f32 to vector<8x128xf32>
    %128 = arith.cmpf ogt, %125, %127 : vector<8x128xf32>
    %129 = arith.extui %128 : vector<8x128xi1> to vector<8x128xi32>
    %130 = arith.sitofp %129 : vector<8x128xi32> to vector<8x128xf32>
    %cst_45 = arith.constant 0.949999988 : f32
    %131 = vector.broadcast %cst_45 : f32 to vector<8x128xf32>
    %132 = arith.mulf %131, %125 : vector<8x128xf32>
    %133 = arith.addf %132, %126 : vector<8x128xf32>
    %cst_46 = arith.constant 1.000000e+00 : f32
    %134 = vector.broadcast %cst_46 : f32 to vector<8x128xf32>
    %135 = arith.mulf %130, %134 : vector<8x128xf32>
    %136 = arith.subf %133, %135 : vector<8x128xf32>
    %cst_47 = arith.constant 1.000000e+00 : f32
    %137 = vector.broadcast %cst_47 : f32 to vector<8x128xf32>
    %138 = arith.cmpf ogt, %136, %137 : vector<8x128xf32>
    %139 = arith.extui %138 : vector<8x128xi1> to vector<8x128xi32>
    %140 = arith.sitofp %139 : vector<8x128xi32> to vector<8x128xf32>
    %141 = vector.extract_strided_slice %124 {offsets = [8, 0], sizes = [8, 128], strides = [1, 1]} : vector<64x128xf32> to vector<8x128xf32>
    %cst_48 = arith.constant 1.000000e+00 : f32
    %142 = vector.broadcast %cst_48 : f32 to vector<8x128xf32>
    %143 = arith.cmpf ogt, %136, %142 : vector<8x128xf32>
    %144 = arith.extui %143 : vector<8x128xi1> to vector<8x128xi32>
    %145 = arith.sitofp %144 : vector<8x128xi32> to vector<8x128xf32>
    %cst_49 = arith.constant 0.949999988 : f32
    %146 = vector.broadcast %cst_49 : f32 to vector<8x128xf32>
    %147 = arith.mulf %146, %136 : vector<8x128xf32>
    %148 = arith.addf %147, %141 : vector<8x128xf32>
    %cst_50 = arith.constant 1.000000e+00 : f32
    %149 = vector.broadcast %cst_50 : f32 to vector<8x128xf32>
    %150 = arith.mulf %145, %149 : vector<8x128xf32>
    %151 = arith.subf %148, %150 : vector<8x128xf32>
    %cst_51 = arith.constant 1.000000e+00 : f32
    %152 = vector.broadcast %cst_51 : f32 to vector<8x128xf32>
    %153 = arith.cmpf ogt, %151, %152 : vector<8x128xf32>
    %154 = arith.extui %153 : vector<8x128xi1> to vector<8x128xi32>
    %155 = arith.sitofp %154 : vector<8x128xi32> to vector<8x128xf32>
    %156 = vector.extract_strided_slice %124 {offsets = [16, 0], sizes = [8, 128], strides = [1, 1]} : vector<64x128xf32> to vector<8x128xf32>
    %cst_52 = arith.constant 1.000000e+00 : f32
    %157 = vector.broadcast %cst_52 : f32 to vector<8x128xf32>
    %158 = arith.cmpf ogt, %151, %157 : vector<8x128xf32>
    %159 = arith.extui %158 : vector<8x128xi1> to vector<8x128xi32>
    %160 = arith.sitofp %159 : vector<8x128xi32> to vector<8x128xf32>
    %cst_53 = arith.constant 0.949999988 : f32
    %161 = vector.broadcast %cst_53 : f32 to vector<8x128xf32>
    %162 = arith.mulf %161, %151 : vector<8x128xf32>
    %163 = arith.addf %162, %156 : vector<8x128xf32>
    %cst_54 = arith.constant 1.000000e+00 : f32
    %164 = vector.broadcast %cst_54 : f32 to vector<8x128xf32>
    %165 = arith.mulf %160, %164 : vector<8x128xf32>
    %166 = arith.subf %163, %165 : vector<8x128xf32>
    %cst_55 = arith.constant 1.000000e+00 : f32
    %167 = vector.broadcast %cst_55 : f32 to vector<8x128xf32>
    %168 = arith.cmpf ogt, %166, %167 : vector<8x128xf32>
    %169 = arith.extui %168 : vector<8x128xi1> to vector<8x128xi32>
    %170 = arith.sitofp %169 : vector<8x128xi32> to vector<8x128xf32>
    %171 = vector.extract_strided_slice %124 {offsets = [24, 0], sizes = [8, 128], strides = [1, 1]} : vector<64x128xf32> to vector<8x128xf32>
    %cst_56 = arith.constant 1.000000e+00 : f32
    %172 = vector.broadcast %cst_56 : f32 to vector<8x128xf32>
    %173 = arith.cmpf ogt, %166, %172 : vector<8x128xf32>
    %174 = arith.extui %173 : vector<8x128xi1> to vector<8x128xi32>
    %175 = arith.sitofp %174 : vector<8x128xi32> to vector<8x128xf32>
    %cst_57 = arith.constant 0.949999988 : f32
    %176 = vector.broadcast %cst_57 : f32 to vector<8x128xf32>
    %177 = arith.mulf %176, %166 : vector<8x128xf32>
    %178 = arith.addf %177, %171 : vector<8x128xf32>
    %cst_58 = arith.constant 1.000000e+00 : f32
    %179 = vector.broadcast %cst_58 : f32 to vector<8x128xf32>
    %180 = arith.mulf %175, %179 : vector<8x128xf32>
    %181 = arith.subf %178, %180 : vector<8x128xf32>
    %cst_59 = arith.constant 1.000000e+00 : f32
    %182 = vector.broadcast %cst_59 : f32 to vector<8x128xf32>
    %183 = arith.cmpf ogt, %181, %182 : vector<8x128xf32>
    %184 = arith.extui %183 : vector<8x128xi1> to vector<8x128xi32>
    %185 = arith.sitofp %184 : vector<8x128xi32> to vector<8x128xf32>
    %186 = vector.extract_strided_slice %124 {offsets = [32, 0], sizes = [8, 128], strides = [1, 1]} : vector<64x128xf32> to vector<8x128xf32>
    %cst_60 = arith.constant 1.000000e+00 : f32
    %187 = vector.broadcast %cst_60 : f32 to vector<8x128xf32>
    %188 = arith.cmpf ogt, %181, %187 : vector<8x128xf32>
    %189 = arith.extui %188 : vector<8x128xi1> to vector<8x128xi32>
    %190 = arith.sitofp %189 : vector<8x128xi32> to vector<8x128xf32>
    %cst_61 = arith.constant 0.949999988 : f32
    %191 = vector.broadcast %cst_61 : f32 to vector<8x128xf32>
    %192 = arith.mulf %191, %181 : vector<8x128xf32>
    %193 = arith.addf %192, %186 : vector<8x128xf32>
    %cst_62 = arith.constant 1.000000e+00 : f32
    %194 = vector.broadcast %cst_62 : f32 to vector<8x128xf32>
    %195 = arith.mulf %190, %194 : vector<8x128xf32>
    %196 = arith.subf %193, %195 : vector<8x128xf32>
    %cst_63 = arith.constant 1.000000e+00 : f32
    %197 = vector.broadcast %cst_63 : f32 to vector<8x128xf32>
    %198 = arith.cmpf ogt, %196, %197 : vector<8x128xf32>
    %199 = arith.extui %198 : vector<8x128xi1> to vector<8x128xi32>
    %200 = arith.sitofp %199 : vector<8x128xi32> to vector<8x128xf32>
    %201 = vector.extract_strided_slice %124 {offsets = [40, 0], sizes = [8, 128], strides = [1, 1]} : vector<64x128xf32> to vector<8x128xf32>
    %cst_64 = arith.constant 1.000000e+00 : f32
    %202 = vector.broadcast %cst_64 : f32 to vector<8x128xf32>
    %203 = arith.cmpf ogt, %196, %202 : vector<8x128xf32>
    %204 = arith.extui %203 : vector<8x128xi1> to vector<8x128xi32>
    %205 = arith.sitofp %204 : vector<8x128xi32> to vector<8x128xf32>
    %cst_65 = arith.constant 0.949999988 : f32
    %206 = vector.broadcast %cst_65 : f32 to vector<8x128xf32>
    %207 = arith.mulf %206, %196 : vector<8x128xf32>
    %208 = arith.addf %207, %201 : vector<8x128xf32>
    %cst_66 = arith.constant 1.000000e+00 : f32
    %209 = vector.broadcast %cst_66 : f32 to vector<8x128xf32>
    %210 = arith.mulf %205, %209 : vector<8x128xf32>
    %211 = arith.subf %208, %210 : vector<8x128xf32>
    %cst_67 = arith.constant 1.000000e+00 : f32
    %212 = vector.broadcast %cst_67 : f32 to vector<8x128xf32>
    %213 = arith.cmpf ogt, %211, %212 : vector<8x128xf32>
    %214 = arith.extui %213 : vector<8x128xi1> to vector<8x128xi32>
    %215 = arith.sitofp %214 : vector<8x128xi32> to vector<8x128xf32>
    %216 = vector.extract_strided_slice %124 {offsets = [48, 0], sizes = [8, 128], strides = [1, 1]} : vector<64x128xf32> to vector<8x128xf32>
    %cst_68 = arith.constant 1.000000e+00 : f32
    %217 = vector.broadcast %cst_68 : f32 to vector<8x128xf32>
    %218 = arith.cmpf ogt, %211, %217 : vector<8x128xf32>
    %219 = arith.extui %218 : vector<8x128xi1> to vector<8x128xi32>
    %220 = arith.sitofp %219 : vector<8x128xi32> to vector<8x128xf32>
    %cst_69 = arith.constant 0.949999988 : f32
    %221 = vector.broadcast %cst_69 : f32 to vector<8x128xf32>
    %222 = arith.mulf %221, %211 : vector<8x128xf32>
    %223 = arith.addf %222, %216 : vector<8x128xf32>
    %cst_70 = arith.constant 1.000000e+00 : f32
    %224 = vector.broadcast %cst_70 : f32 to vector<8x128xf32>
    %225 = arith.mulf %220, %224 : vector<8x128xf32>
    %226 = arith.subf %223, %225 : vector<8x128xf32>
    %cst_71 = arith.constant 1.000000e+00 : f32
    %227 = vector.broadcast %cst_71 : f32 to vector<8x128xf32>
    %228 = arith.cmpf ogt, %226, %227 : vector<8x128xf32>
    %229 = arith.extui %228 : vector<8x128xi1> to vector<8x128xi32>
    %230 = arith.sitofp %229 : vector<8x128xi32> to vector<8x128xf32>
    %231 = vector.extract_strided_slice %124 {offsets = [56, 0], sizes = [8, 128], strides = [1, 1]} : vector<64x128xf32> to vector<8x128xf32>
    %cst_72 = arith.constant 1.000000e+00 : f32
    %232 = vector.broadcast %cst_72 : f32 to vector<8x128xf32>
    %233 = arith.cmpf ogt, %226, %232 : vector<8x128xf32>
    %234 = arith.extui %233 : vector<8x128xi1> to vector<8x128xi32>
    %235 = arith.sitofp %234 : vector<8x128xi32> to vector<8x128xf32>
    %cst_73 = arith.constant 0.949999988 : f32
    %236 = vector.broadcast %cst_73 : f32 to vector<8x128xf32>
    %237 = arith.mulf %236, %226 : vector<8x128xf32>
    %238 = arith.addf %237, %231 : vector<8x128xf32>
    %cst_74 = arith.constant 1.000000e+00 : f32
    %239 = vector.broadcast %cst_74 : f32 to vector<8x128xf32>
    %240 = arith.mulf %235, %239 : vector<8x128xf32>
    %241 = arith.subf %238, %240 : vector<8x128xf32>
    %cst_75 = arith.constant 1.000000e+00 : f32
    %242 = vector.broadcast %cst_75 : f32 to vector<8x128xf32>
    %243 = arith.cmpf ogt, %241, %242 : vector<8x128xf32>
    %244 = arith.extui %243 : vector<8x128xi1> to vector<8x128xi32>
    %245 = arith.sitofp %244 : vector<8x128xi32> to vector<8x128xf32>
    %246 = vector.shape_cast %140 : vector<8x128xf32> to vector<1x8x128xf32>
    %247 = vector.shape_cast %155 : vector<8x128xf32> to vector<1x8x128xf32>
    %248 = vector.shape_cast %170 : vector<8x128xf32> to vector<1x8x128xf32>
    %249 = vector.shape_cast %185 : vector<8x128xf32> to vector<1x8x128xf32>
    %250 = vector.shape_cast %200 : vector<8x128xf32> to vector<1x8x128xf32>
    %251 = vector.shape_cast %215 : vector<8x128xf32> to vector<1x8x128xf32>
    %252 = vector.shape_cast %230 : vector<8x128xf32> to vector<1x8x128xf32>
    %253 = vector.shape_cast %245 : vector<8x128xf32> to vector<1x8x128xf32>
    %254 = tpu.concatenate %246, %247, %248, %249, %250, %251, %252, %253 in 0 : vector<1x8x128xf32>, vector<1x8x128xf32>, vector<1x8x128xf32>, vector<1x8x128xf32>, vector<1x8x128xf32>, vector<1x8x128xf32>, vector<1x8x128xf32>, vector<1x8x128xf32> -> vector<8x8x128xf32>
    %255 = vector.shape_cast %136 : vector<8x128xf32> to vector<1x8x128xf32>
    %256 = vector.shape_cast %151 : vector<8x128xf32> to vector<1x8x128xf32>
    %257 = vector.shape_cast %166 : vector<8x128xf32> to vector<1x8x128xf32>
    %258 = vector.shape_cast %181 : vector<8x128xf32> to vector<1x8x128xf32>
    %259 = vector.shape_cast %196 : vector<8x128xf32> to vector<1x8x128xf32>
    %260 = vector.shape_cast %211 : vector<8x128xf32> to vector<1x8x128xf32>
    %261 = vector.shape_cast %226 : vector<8x128xf32> to vector<1x8x128xf32>
    %262 = vector.shape_cast %241 : vector<8x128xf32> to vector<1x8x128xf32>
    %263 = tpu.concatenate %255, %256, %257, %258, %259, %260, %261, %262 in 0 : vector<1x8x128xf32>, vector<1x8x128xf32>, vector<1x8x128xf32>, vector<1x8x128xf32>, vector<1x8x128xf32>, vector<1x8x128xf32>, vector<1x8x128xf32>, vector<1x8x128xf32> -> vector<8x8x128xf32>
    %264 = vector.shape_cast %254 : vector<8x8x128xf32> to vector<1x8x8x128xf32>
    %265 = vector.shape_cast %263 : vector<8x8x128xf32> to vector<1x8x8x128xf32>
    %266 = tpu.concatenate %264, %265 in 0 : vector<1x8x8x128xf32>, vector<1x8x8x128xf32> -> vector<2x8x8x128xf32>
    %c0_76 = arith.constant 0 : index
    %c0_77 = arith.constant 0 : index
    %c0_78 = arith.constant 0 : index
    %c0_79 = arith.constant 0 : index
    %267 = vector.load %arg5[%c0_76, %c0_77, %c0_78, %c0_79] : memref<2x8x8x128xf32, #tpu.memory_space<vmem>>, vector<2x8x8x128xf32>
    tpu.vector_store %arg5[%c0_76, %c0_77, %c0_78, %c0_79], %266 {strides = array<i32>} : memref<2x8x8x128xf32, #tpu.memory_space<vmem>>, vector<2x8x8x128xf32>,
    return
  }
}

</mosaic_0001>

<bundles_post_ra>
// kernel: snn_forward.1
= control target key start
LH: loop header
LB: loop body
LE: loop exit
PB: predicated region body
PF: predicated region fallthrough
CT: control target
= control target key end

     0   :  { %vm33_vm0 = vcmask 523264   ;;  %v312_v29 = vmov 1.0   ;;  %v313_v31 = vmov 0.0   ;;  %s488_s1 = inlined_call_operand.vmem [shape: f32[64,128], index: 1, kind: input, shape index: {}]   ;;  %s489_s3 = inlined_call_operand.vmem [shape: f32[128,128], index: 3, kind: input, shape index: {}]   ;;  %s490_s2 = inlined_call_operand.vmem [shape: f32[1,128], index: 2, kind: input, shape index: {}]   ;;  %s491_s0 = inlined_call_operand.vmem [shape: f32[8,64], index: 0, kind: input, shape index: {}]   ;;  %s492_s4 = inlined_call_operand.vmem [shape: f32[1,128], index: 4, kind: input, shape index: {}]   ;;  %s493_s5 = inlined_call_operand.vmem [shape: f32[2,8,8,128], index: 5, kind: output, shape index: {}]  }
   0x1   :  { %v28_v0 = vld [vmem:[%s488_s1 + $0x38] sm:$0xff]  ;;  %v27_v1 = vld [vmem:[%s488_s1 + $0x30] sm:$0xff]  ;;  %v26_v2 = vld [vmem:[%s488_s1 + $0x28] sm:$0xff] }
   0x2   :  { %45 = vmatpush.msra.mxu1 %v28_v0  ;;  %v122_v3 = vld [vmem:[%s489_s3 + $0x78] sm:$0xff]  ;;  %v121_v4 = vld [vmem:[%s489_s3 + $0x70] sm:$0xff]  ;;  %v25_v5 = vld [vmem:[%s488_s1 + $0x20] sm:$0xff] }
   0x3   :  { %127 = vmatpush.msra.mxu0 %v122_v3  ;;  %261 = vmatpush.msra.mxu2 %v122_v3  ;;  %v120_v6 = vld [vmem:[%s489_s3 + $0x68] sm:$0xff]  ;;  %v24_v7 = vld [vmem:[%s488_s1 + $0x18] sm:$0xff]  ;;  %v119_v8 = vld [vmem:[%s489_s3 + $0x60] sm:$0xff] }
   0x4   :  { %46 = vmatpush.msra.mxu1 %v27_v1  ;;  %262 = vmatpush.msra.mxu3 %v122_v3  ;;  %v23_v9 = vld [vmem:[%s488_s1 + $0x10] sm:$0xff]  ;;  %v118_v10 = vld [vmem:[%s489_s3 + $0x58] sm:$0xff]  ;;  %v22_v11 = vld [vmem:[%s488_s1 + $0x8] sm:$0xff] }
   0x5   :  { %128 = vmatpush.msra.mxu0 %v121_v4  ;;  %264 = vmatpush.msra.mxu2 %v121_v4  ;;  %v117_v12 = vld [vmem:[%s489_s3 + $0x50] sm:$0xff]  ;;  %v21_v13 = vld [vmem:[%s488_s1] sm:$0xff]  ;;  %v116_v15 = vld [vmem:[%s489_s3 + $0x48] sm:$0xff] }
   0x6   :  { %47 = vmatpush.msra.mxu1 %v26_v2  ;;  %265 = vmatpush.msra.mxu3 %v121_v4  ;;  %v20_v14 = vld [vmem:[%s491_s0] sm:$0xff]  ;;  %v114_v17 = vld [vmem:[%s489_s3 + $0x38] sm:$0xff]  ;;  %v113_v18 = vld [vmem:[%s489_s3 + $0x30] sm:$0xff] }
   0x7   :  { %129 = vmatpush.msra.mxu0 %v120_v6  ;;  %267 = vmatpush.msra.mxu2 %v120_v6  ;;  %v115_v16 = vld [vmem:[%s489_s3 + $0x40] sm:$0xff]  ;;  %v112_v19 = vld [vmem:[%s489_s3 + $0x28] sm:$0xff]  ;;  %v110_v21 = vld [vmem:[%s489_s3 + $0x18] sm:$0xff] }
   0x8   :  { %48 = vmatpush.msra.mxu1 %v25_v5  ;;  %268 = vmatpush.msra.mxu3 %v120_v6  ;;  %v111_v20 = vld [vmem:[%s489_s3 + $0x20] sm:$0xff]  ;;  %v109_v22 = vld [vmem:[%s489_s3 + $0x10] sm:$0xff]  ;;  %v108_v23 = vld [vmem:[%s489_s3 + $0x8] sm:$0xff] }
   0x9   :  { %130 = vmatpush.msra.mxu0 %v119_v8  ;;  %270 = vmatpush.msra.mxu2 %v119_v8  ;;  %v107_v24 = vld [vmem:[%s489_s3] sm:$0xff] }
   0xa   :  { %49 = vmatpush.msra.mxu1 %v24_v7  ;;  %271 = vmatpush.msra.mxu3 %v119_v8  ;;  %v310_v25 = vld [vmem:[%s490_s2] ss:$0 sm:$0xff] }
   0xb   :  { %131 = vmatpush.msra.mxu0 %v118_v10  ;;  %273 = vmatpush.msra.mxu2 %v118_v10  ;;  %v311_v58 = vld [vmem:[%s492_s4] ss:$0 sm:$0xff] }
   0xc   :  { %50 = vmatpush.msra.mxu1 %v23_v9  ;;  %274 = vmatpush.msra.mxu3 %v118_v10 }
   0xd   :  { %132 = vmatpush.msra.mxu0 %v117_v12  ;;  %276 = vmatpush.msra.mxu2 %v117_v12 }
   0xe   :  { %51 = vmatpush.msra.mxu1 %v22_v11  ;;  %277 = vmatpush.msra.mxu3 %v117_v12 }
   0xf   :  { %133 = vmatpush.msra.mxu0 %v116_v15  ;;  %279 = vmatpush.msra.mxu2 %v116_v15 }
  0x10   :  { %52 = vmatpush.msra.mxu1 %v21_v13  ;;  %280 = vmatpush.msra.mxu3 %v116_v15 }
  0x11   :  { %235 = vmatmul.msk.f32.vlgmr.msra.gmra.mxu1 %vm33_vm0, %v20_v14  ;;  %134 = vmatpush.msra.mxu0 %v115_v16 }
  0x12   :  { %260 = vmatpush.msrb.mxu1 %v122_v3  ;;  %282 = vmatpush.msra.mxu2 %v115_v16 }
  0x13   :  { %135 = vmatpush.msra.mxu0 %v114_v17  ;;  %283 = vmatpush.msra.mxu3 %v115_v16 }
  0x14   :  { %263 = vmatpush.msrb.mxu1 %v121_v4  ;;  %285 = vmatpush.msra.mxu2 %v114_v17 }
  0x15   :  { %136 = vmatpush.msra.mxu0 %v113_v18  ;;  %286 = vmatpush.msra.mxu3 %v114_v17 }
  0x16   :  { %266 = vmatpush.msrb.mxu1 %v120_v6  ;;  %288 = vmatpush.msra.mxu2 %v113_v18 }
  0x17   :  { %137 = vmatpush.msra.mxu0 %v112_v19  ;;  %289 = vmatpush.msra.mxu3 %v113_v18 }
  0x18   :  { %269 = vmatpush.msrb.mxu1 %v119_v8  ;;  %291 = vmatpush.msra.mxu2 %v112_v19 }
  0x19   :  { %138 = vmatpush.msra.mxu0 %v111_v20  ;;  %292 = vmatpush.msra.mxu3 %v112_v19 }
  0x1a   :  { %272 = vmatpush.msrb.mxu1 %v118_v10  ;;  %294 = vmatpush.msra.mxu2 %v111_v20 }
  0x1b   :  { %139 = vmatpush.msra.mxu0 %v110_v21  ;;  %295 = vmatpush.msra.mxu3 %v111_v20 }
  0x1c   :  { %275 = vmatpush.msrb.mxu1 %v117_v12  ;;  %297 = vmatpush.msra.mxu2 %v110_v21 }
  0x1d   :  { %140 = vmatpush.msra.mxu0 %v109_v22  ;;  %298 = vmatpush.msra.mxu3 %v110_v21 }
  0x1e   :  { %278 = vmatpush.msrb.mxu1 %v116_v15  ;;  %300 = vmatpush.msra.mxu2 %v109_v22 }
  0x1f   :  { %301 = vmatpush.msra.mxu3 %v109_v22  ;;  %141 = vmatpush.msra.mxu0 %v108_v23 }
  0x20   :  { %281 = vmatpush.msrb.mxu1 %v115_v16  ;;  %303 = vmatpush.msra.mxu2 %v108_v23 }
  0x21   :  { %304 = vmatpush.msra.mxu3 %v108_v23  ;;  %142 = vmatpush.msra.mxu0 %v107_v24 }
  0x22   :  { %284 = vmatpush.msrb.mxu1 %v114_v17  ;;  %306 = vmatpush.msra.mxu2 %v107_v24 }
  0x23   :  { %307 = vmatpush.msra.mxu3 %v107_v24 }
  0x24   :  { %287 = vmatpush.msrb.mxu1 %v113_v18 }
  0x26   :  { %290 = vmatpush.msrb.mxu1 %v112_v19 }
  0x28   :  { %293 = vmatpush.msrb.mxu1 %v111_v20 }
  0x2a   :  { %296 = vmatpush.msrb.mxu1 %v110_v21 }
  0x2c   :  { %299 = vmatpush.msrb.mxu1 %v109_v22 }
  0x2e   :  { %302 = vmatpush.msrb.mxu1 %v108_v23 }
  0x30   :  { %305 = vmatpush.msrb.mxu1 %v107_v24 }
  0x8e   :  { %v54_v26 = vpop.f32.mrf.mxu1 }
  0x8f   :  { %v55_v27 = vadd.f32 %v310_v25, %v54_v26 }
  0x91   :  { %vm62_vm1 = vcmp.gt.f32.partialorder %v55_v27, 1.0  ;;  %v65_v28 = vmul.f32 0.95, %v55_v27 }
  0x92   :  { %244 = vmatmul.msk.f32.vlgmr.msra.gmra.mxu0 %vm62_vm1, %v312_v29  ;;  %v236_v32 = vsel %vm62_vm1, 1.0, %v313_v31 }
  0x93   :  { %v66_v30 = vadd.f32 %v65_v28, %v55_v27 }
  0x95   :  { %v67_v33 = vsub.f32 %v66_v30, %v236_v32 }
  0x97   :  { %vm68_vm2 = vcmp.gt.f32.partialorder %v67_v33, 1.0  ;;  %v71_v34 = vmul.f32 0.95, %v67_v33 }
  0x98   :  { %v237_v36 = vsel %vm68_vm2, 1.0, %v313_v31 }
  0x99   :  { %v72_v35 = vadd.f32 %v71_v34, %v55_v27 }
  0x9a   :  { %245 = vmatmul.msk.f32.gmra.mxu0 %vm68_vm2, %v312_v29 }
  0x9b   :  { %v73_v37 = vsub.f32 %v72_v35, %v237_v36 }
  0x9d   :  { %v77_v38 = vmul.f32 0.95, %v73_v37  ;;  %vm74_vm3 = vcmp.gt.f32.partialorder %v73_v37, 1.0 }
  0x9e   :  { %246 = vmatmul.msk.f32.vlgmr.msrb.gmra.mxu1 %vm74_vm3, %v312_v29  ;;  %v238_v40 = vsel %vm74_vm3, 1.0, %v313_v31 }
  0x9f   :  { %v78_v39 = vadd.f32 %v77_v38, %v55_v27 }
  0xa1   :  { %v79_v41 = vsub.f32 %v78_v39, %v238_v40 }
  0xa3   :  { %vm80_vm4 = vcmp.gt.f32.partialorder %v79_v41, 1.0  ;;  %v83_v42 = vmul.f32 0.95, %v79_v41 }
  0xa4   :  { %247 = vmatmul.msk.f32.vlgmr.msra.gmra.mxu2 %vm80_vm4, %v312_v29  ;;  %v239_v44 = vsel %vm80_vm4, 1.0, %v313_v31 }
  0xa5   :  { %v84_v43 = vadd.f32 %v83_v42, %v55_v27 }
  0xa7   :  { %v85_v45 = vsub.f32 %v84_v43, %v239_v44 }
  0xa9   :  { %vm86_vm5 = vcmp.gt.f32.partialorder %v85_v45, 1.0  ;;  %v89_v46 = vmul.f32 0.95, %v85_v45 }
  0xaa   :  { %v240_v48 = vsel %vm86_vm5, 1.0, %v313_v31 }
  0xab   :  { %v90_v47 = vadd.f32 %v89_v46, %v55_v27 }
  0xac   :  { %248 = vmatmul.msk.f32.gmra.mxu2 %vm86_vm5, %v312_v29 }
  0xad   :  { %v91_v49 = vsub.f32 %v90_v47, %v240_v48 }
  0xaf   :  { %vm92_vm6 = vcmp.gt.f32.partialorder %v91_v49, 1.0  ;;  %v95_v50 = vmul.f32 0.95, %v91_v49 }
  0xb0   :  { %249 = vmatmul.msk.f32.vlgmr.msra.gmra.mxu3 %vm92_vm6, %v312_v29  ;;  %v241_v52 = vsel %vm92_vm6, 1.0, %v313_v31 }
  0xb1   :  { %v96_v51 = vadd.f32 %v95_v50, %v55_v27 }
  0xb3   :  { %v97_v53 = vsub.f32 %v96_v51, %v241_v52 }
  0xb5   :  { %v101_v54 = vmul.f32 0.95, %v97_v53  ;;  %vm98_vm7 = vcmp.gt.f32.partialorder %v97_v53, 1.0 }
  0xb6   :  { %v242_v56 = vsel %vm98_vm7, 1.0, %v313_v31 }
  0xb7   :  { %v102_v55 = vadd.f32 %v101_v54, %v55_v27 }
  0xb8   :  { %250 = vmatmul.msk.f32.gmra.mxu3 %vm98_vm7, %v312_v29 }
  0xb9   :  { %v103_v57 = vsub.f32 %v102_v55, %v242_v56 }
  0xbb   :  { %vm104_vm8 = vcmp.gt.f32.partialorder %v103_v57, 1.0 }
  0xc0   :  { %251 = vmatmul.msk.f32.gmra.mxu3 %vm104_vm8, %v312_v29 }
 0x10f   :  { %v144_v59 = vpop.f32.mrf.mxu0 }
 0x110   :  { %v145_v60 = vadd.f32 %v311_v58, %v144_v59 }
 0x112   :  { %vm170_vm9 = vcmp.gt.f32.partialorder %v145_v60, 1.0  ;;  %223 = vst [vmem:[%s493_s5 + $0x40] sm:$0xff] %v145_v60  ;;  %v173_v0 = vmul.f32 0.95, %v145_v60 }
 0x113   :  { %v252_v61 = vsel %vm170_vm9, 1.0, %v313_v31 }
 0x114   :  { %215 = vst [vmem:[%s493_s5] sm:$0xff] %v252_v61 }
 0x117   :  { %v147_v62 = vpop.f32.mrf.mxu0 }
 0x118   :  { %v148_v63 = vadd.f32 %v311_v58, %v147_v62 }
 0x11a   :  { %v174_v1 = vadd.f32 %v173_v0, %v148_v63 }
 0x11b   :  { %v150_v2 = vpop.f32.mrf.mxu1 }
 0x11c   :  { %v175_v3 = vsub.f32 %v174_v1, %v252_v61  ;;  %v151_v4 = vadd.f32 %v311_v58, %v150_v2 }
 0x11e   :  { %224 = vst [vmem:[%s493_s5 + $0x48] sm:$0xff] %v175_v3  ;;  %vm176_vm10 = vcmp.gt.f32.partialorder %v175_v3, 1.0  ;;  %v179_v5 = vmul.f32 0.95, %v175_v3 }
 0x11f   :  { %v253_v6 = vsel %vm176_vm10, 1.0, %v313_v31 }
 0x120   :  { %v180_v7 = vadd.f32 %v179_v5, %v151_v4  ;;  %216 = vst [vmem:[%s493_s5 + $0x8] sm:$0xff] %v253_v6 }
 0x122   :  { %v181_v8 = vsub.f32 %v180_v7, %v253_v6 }
 0x124   :  { %225 = vst [vmem:[%s493_s5 + $0x50] sm:$0xff] %v181_v8  ;;  %vm182_vm11 = vcmp.gt.f32.partialorder %v181_v8, 1.0  ;;  %v185_v12 = vmul.f32 0.95, %v181_v8 }
 0x125   :  { %v254_v9 = vsel %vm182_vm11, 1.0, %v313_v31 }
 0x126   :  { %217 = vst [vmem:[%s493_s5 + $0x10] sm:$0xff] %v254_v9 }
 0x127   :  { %v153_v10 = vpop.f32.mrf.mxu2 }
 0x128   :  { %v154_v11 = vadd.f32 %v311_v58, %v153_v10 }
 0x12a   :  { %v186_v13 = vadd.f32 %v185_v12, %v154_v11 }
 0x12c   :  { %v187_v14 = vsub.f32 %v186_v13, %v254_v9 }
 0x12e   :  { %226 = vst [vmem:[%s493_s5 + $0x58] sm:$0xff] %v187_v14  ;;  %vm188_vm12 = vcmp.gt.f32.partialorder %v187_v14, 1.0  ;;  %v191_v18 = vmul.f32 0.95, %v187_v14 }
 0x12f   :  { %v156_v15 = vpop.f32.mrf.mxu2  ;;  %v255_v16 = vsel %vm188_vm12, 1.0, %v313_v31 }
 0x130   :  { %v157_v17 = vadd.f32 %v311_v58, %v156_v15  ;;  %218 = vst [vmem:[%s493_s5 + $0x18] sm:$0xff] %v255_v16 }
 0x132   :  { %v192_v19 = vadd.f32 %v191_v18, %v157_v17 }
 0x133   :  { %v159_v20 = vpop.f32.mrf.mxu3 }
 0x134   :  { %v193_v21 = vsub.f32 %v192_v19, %v255_v16  ;;  %v160_v22 = vadd.f32 %v311_v58, %v159_v20 }
 0x136   :  { %227 = vst [vmem:[%s493_s5 + $0x60] sm:$0xff] %v193_v21  ;;  %vm194_vm13 = vcmp.gt.f32.partialorder %v193_v21, 1.0  ;;  %v197_v23 = vmul.f32 0.95, %v193_v21 }
 0x137   :  { %v256_v24 = vsel %vm194_vm13, 1.0, %v313_v31 }
 0x138   :  { %v198_v25 = vadd.f32 %v197_v23, %v160_v22  ;;  %219 = vst [vmem:[%s493_s5 + $0x20] sm:$0xff] %v256_v24 }
 0x13a   :  { %v199_v26 = vsub.f32 %v198_v25, %v256_v24 }
 0x13b   :  { %v162_v27 = vpop.f32.mrf.mxu3 }
 0x13c   :  { %228 = vst [vmem:[%s493_s5 + $0x68] sm:$0xff] %v199_v26  ;;  %v163_v28 = vadd.f32 %v311_v58, %v162_v27  ;;  %vm200_vm14 = vcmp.gt.f32.partialorder %v199_v26, 1.0  ;;  %v203_v29 = vmul.f32 0.95, %v199_v26 }
 0x13d   :  { %v257_v30 = vsel %vm200_vm14, 1.0, %v313_v31 }
 0x13e   :  { %v204_v32 = vadd.f32 %v203_v29, %v163_v28  ;;  %220 = vst [vmem:[%s493_s5 + $0x28] sm:$0xff] %v257_v30 }
 0x140   :  { %v205_v33 = vsub.f32 %v204_v32, %v257_v30 }
 0x142   :  { %229 = vst [vmem:[%s493_s5 + $0x70] sm:$0xff] %v205_v33  ;;  %vm206_vm15 = vcmp.gt.f32.partialorder %v205_v33, 1.0  ;;  %v209_v37 = vmul.f32 0.95, %v205_v33 }
 0x143   :  { %v165_v34 = vpop.f32.mrf.mxu3  ;;  %v258_v35 = vsel %vm206_vm15, 1.0, %v313_v31 }
 0x144   :  { %v166_v36 = vadd.f32 %v311_v58, %v165_v34  ;;  %221 = vst [vmem:[%s493_s5 + $0x30] sm:$0xff] %v258_v35 }
 0x146   :  { %v210_v38 = vadd.f32 %v209_v37, %v166_v36 }
 0x148   :  { %v211_v39 = vsub.f32 %v210_v38, %v258_v35 }
 0x14a   :  { %vm212_vm0 = vcmp.gt.f32.partialorder %v211_v39, 1.0  ;;  %230 = vst [vmem:[%s493_s5 + $0x78] sm:$0xff] %v211_v39 }
 0x14b   :  { %v259_v40 = vsel %vm212_vm0, 1.0, %v313_v31 }
 0x14c   :  { %222 = vst [vmem:[%s493_s5 + $0x38] sm:$0xff] %v259_v40 }

</bundles_post_ra>
